<compile_context>
chip_gen: v5e
topology: v5e:2x2
jax: 0.10.0
libtpu: 0.0.40
codegen_flags: <defaults>
</compile_context>

<pallas_src>
import jax
import jax.numpy as jnp
from jax.experimental import pallas as pl
from jax.experimental.pallas import tpu as pltpu


LANE = 128           # lane width: feature dims padded to multiples of this
SUBLANE_BF16 = 16    # bf16 sublane packing: batch tile is a multiple of this
MAX_TM = 512         # ~85% of HBM roofline per measured tile-size curve


def _round_up(x, m):
    return (x + m - 1) // m * m


def _make_mlp_kernel(n_layers):
    """Fused (Dropout(p=0.0) -> Linear) * n_layers on one batch tile."""

    def kernel(*refs):
        x_ref = refs[0]
        out_ref = refs[-1]
        params = refs[1:-1]  # (w0, b0, w1, b1, ...)

        # Dropout with p=0.0 is the identity (module default).
        # TODO(synk): stochastic dropout (p>0) would need pltpu.prng_* here.
        h = x_ref[...]  # bf16 tile (TM, D0) — MXU native input dtype.
        for i in range(n_layers):
            w = params[2 * i][...]        # bf16 (D_in_p, D_out_p), resident
            b = params[2 * i + 1][...]    # f32  (1, D_out_p), resident
            acc = jnp.dot(h, w, preferred_element_type=jnp.float32) + b
            if i < n_layers - 1:
                h = acc.astype(jnp.bfloat16)   # re-narrow for next MXU pass
            else:
                out_ref[...] = acc.astype(out_ref.dtype)

    return kernel


@jax.jit
def mlp_layers_forward(x, weights, biases):
    """Runs the full MLP stack in a single (batch-gridded) Pallas kernel.

    x:       (B, layers[0]) float32
    weights: tuple of (in_i, out_i) float32 arrays (already transposed from
             PyTorch's (out, in))
    biases:  tuple of (out_i,) float32 arrays
    """
    n_layers = len(weights)
    batch, in_dim = x.shape
    out_dim = weights[-1].shape[1]

    # --- padded sizes: lane-dense features, sublane-friendly batch tile -----
    dims = [in_dim] + [w.shape[1] for w in weights]
    dims_p = [_round_up(d, LANE) for d in dims]

    tm = min(MAX_TM, _round_up(batch, SUBLANE_BF16))
    b_pad = _round_up(batch, tm)
    nb = b_pad // tm

    # --- build padded operands (zero padding keeps the math exact) ----------
    x_p = jnp.zeros((b_pad, dims_p[0]), jnp.bfloat16)
    x_p = x_p.at[:batch, :in_dim].set(x.astype(jnp.bfloat16))

    args = [x_p]
    in_specs = [pl.BlockSpec((tm, dims_p[0]), lambda i: (i, 0))]
    for li, (w, b) in enumerate(zip(weights, biases)):
        di, do = w.shape
        dpi, dpo = dims_p[li], dims_p[li + 1]
        w_p = jnp.zeros((dpi, dpo), jnp.bfloat16).at[:di, :do].set(
            w.astype(jnp.bfloat16))
        b_p = jnp.zeros((1, dpo), jnp.float32).at[0, :do].set(
            b.astype(jnp.float32))
        args += [w_p, b_p]
        # Constant index_map -> params stay VMEM-resident across batch tiles.
        in_specs += [pl.BlockSpec((dpi, dpo), lambda i: (0, 0)),
                     pl.BlockSpec((1, dpo), lambda i: (0, 0))]

    out_spec = pl.BlockSpec((tm, dims_p[-1]), lambda i: (i, 0))

    # --- explicit VMEM budget: resident params + double-buffered I/O tiles
    #     + live f32 intermediates, with headroom; clamped to fit v5e..v7x. --
    param_bytes = sum(a.size * a.dtype.itemsize for a in args[1:])
    io_bytes = 2 * tm * dims_p[0] * 2 + 2 * tm * dims_p[-1] * 4
    inter_bytes = 2 * tm * max(dims_p) * 4
    vmem_limit = int(min(max(2 * (param_bytes + io_bytes + inter_bytes)
                             + (2 << 20), 16 << 20), 64 << 20))

    out_p = pl.pallas_call(
        _make_mlp_kernel(n_layers),
        out_shape=jax.ShapeDtypeStruct((b_pad, dims_p[-1]), jnp.float32),
        grid=(nb,),
        in_specs=in_specs,
        out_specs=out_spec,
        compiler_params=pltpu.CompilerParams(
            dimension_semantics=("parallel",),   # v7x: 2 TCs share batch tiles
            vmem_limit_bytes=vmem_limit),
    )(*args)

    return out_p[:batch, :out_dim].astype(x.dtype)


def init_mlp_params(key, layers):
    """Deterministic PyTorch-style Linear init: U(-1/sqrt(fan_in), 1/sqrt(fan_in))."""
    weights, biases = [], []
    for in_size, out_size in zip(layers[:-1], layers[1:]):
        key, kw, kb = jax.random.split(key, 3)
        bound = 1.0 / (in_size ** 0.5)
        # Stored as (in, out) == transpose of PyTorch's (out, in).
        w = jax.random.uniform(kw, (in_size, out_size), jnp.float32, -bound, bound)
        b = jax.random.uniform(kb, (out_size,), jnp.float32, -bound, bound)
        weights.append(w)
        biases.append(b)
    return tuple(weights), tuple(biases)


def mlp_reference(x, weights, biases):
    h = x
    for w, b in zip(weights, biases):
        h = h @ w + b
    return h


if __name__ == "__main__":
    key = jax.random.PRNGKey(0)
    layers = [32, 64, 16]   # MLPLayers(layers=[32, 64, 16], dropout=0.0)

    key, kp = jax.random.split(key)
    weights, biases = init_mlp_params(kp, layers)

    # Small config matching the module spec.
    key, kx = jax.random.split(key)
    x_small = jax.random.normal(kx, (8, layers[0]), jnp.float32)
    out_small = jax.block_until_ready(mlp_layers_forward(x_small, weights, biases))
    ref_small = mlp_reference(x_small, weights, biases)
    assert out_small.shape == (8, layers[-1])
    # bf16 MXU operands with f32 accumulation -> ~1e-2-level tolerance vs f32 ref.
    assert jnp.allclose(out_small, ref_small, atol=3e-2, rtol=3e-2)

    # Larger, non-divisible batch: exercises the batch grid (>1 step) + padding.
    key, kx2 = jax.random.split(key)
    x_big = jax.random.normal(kx2, (1040, layers[0]), jnp.float32)
    out_big = jax.block_until_ready(mlp_layers_forward(x_big, weights, biases))
    ref_big = mlp_reference(x_big, weights, biases)
    assert out_big.shape == (1040, layers[-1])
    assert jnp.allclose(out_big, ref_big, atol=3e-2, rtol=3e-2)

    print("KERNEL_OK")
</pallas_src>

<mosaic_0001>
module attributes {stable_mosaic.version = 11 : i64} {
  func.func @kernel(%arg0: i32, %arg1: memref<16x128xbf16, #tpu.memory_space<vmem>>, %arg2: memref<128x128xbf16, #tpu.memory_space<vmem>>, %arg3: memref<1x128xf32, #tpu.memory_space<vmem>>, %arg4: memref<128x128xbf16, #tpu.memory_space<vmem>>, %arg5: memref<1x128xf32, #tpu.memory_space<vmem>>, %arg6: memref<16x128xf32, #tpu.memory_space<vmem>>) attributes {dimension_semantics = [#tpu.dimension_semantics<parallel>], iteration_bounds = array<i64: 1>, scalar_prefetch = 0 : i64, scratch_operands = 0 : i64, tpu.core_type = #tpu.core_type<tc>, window_params = [{transform_indices = @transform_0, window_bounds = array<i64: 16, 128>}, {pipeline_mode = #tpu.pipeline_mode<synchronous>, transform_indices = @transform_1, window_bounds = array<i64: 128, 128>}, {pipeline_mode = #tpu.pipeline_mode<synchronous>, transform_indices = @transform_2, window_bounds = array<i64: 1, 128>}, {pipeline_mode = #tpu.pipeline_mode<synchronous>, transform_indices = @transform_3, window_bounds = array<i64: 128, 128>}, {pipeline_mode = #tpu.pipeline_mode<synchronous>, transform_indices = @transform_4, window_bounds = array<i64: 1, 128>}, {transform_indices = @transform_5, window_bounds = array<i64: 16, 128>}]} {
    %c0 = arith.constant 0 : index
    %c0_0 = arith.constant 0 : index
    %0 = vector.load %arg1[%c0, %c0_0] : memref<16x128xbf16, #tpu.memory_space<vmem>>, vector<16x128xbf16>
    %c0_1 = arith.constant 0 : index
    %c0_2 = arith.constant 0 : index
    %1 = vector.load %arg2[%c0_1, %c0_2] : memref<128x128xbf16, #tpu.memory_space<vmem>>, vector<128x128xbf16>
    %c0_3 = arith.constant 0 : index
    %c0_4 = arith.constant 0 : index
    %2 = vector.load %arg3[%c0_3, %c0_4] : memref<1x128xf32, #tpu.memory_space<vmem>>, vector<1x128xf32>
    %cst = arith.constant dense<0.000000e+00> : vector<16x128xf32>
    %3 = tpu.matmul %0, %1, %cst {dimension_numbers = #tpu.dot_dimension_numbers<[1], [0], [0], [1], [0, 0, 1, 1], [], []>} : vector<16x128xbf16>, vector<128x128xbf16>, vector<16x128xf32> -> vector<16x128xf32>
    %4 = vector.broadcast %2 : vector<1x128xf32> to vector<16x128xf32>
    %5 = arith.addf %3, %4 : vector<16x128xf32>
    %6 = arith.truncf %5 : vector<16x128xf32> to vector<16x128xbf16>
    %c0_5 = arith.constant 0 : index
    %c0_6 = arith.constant 0 : index
    %7 = vector.load %arg4[%c0_5, %c0_6] : memref<128x128xbf16, #tpu.memory_space<vmem>>, vector<128x128xbf16>
    %c0_7 = arith.constant 0 : index
    %c0_8 = arith.constant 0 : index
    %8 = vector.load %arg5[%c0_7, %c0_8] : memref<1x128xf32, #tpu.memory_space<vmem>>, vector<1x128xf32>
    %cst_9 = arith.constant dense<0.000000e+00> : vector<16x128xf32>
    %9 = tpu.matmul %6, %7, %cst_9 {dimension_numbers = #tpu.dot_dimension_numbers<[1], [0], [0], [1], [0, 0, 1, 1], [], []>} : vector<16x128xbf16>, vector<128x128xbf16>, vector<16x128xf32> -> vector<16x128xf32>
    %10 = vector.broadcast %8 : vector<1x128xf32> to vector<16x128xf32>
    %11 = arith.addf %9, %10 : vector<16x128xf32>
    %c0_10 = arith.constant 0 : index
    %c0_11 = arith.constant 0 : index
    %12 = vector.load %arg6[%c0_10, %c0_11] : memref<16x128xf32, #tpu.memory_space<vmem>>, vector<16x128xf32>
    tpu.vector_store %arg6[%c0_10, %c0_11], %11 {strides = array<i32>} : memref<16x128xf32, #tpu.memory_space<vmem>>, vector<16x128xf32>,
    return
  }
  func.func @transform_0(%arg0: i32) -> (i32, i32) {
    %c0_i32 = arith.constant 0 : i32
    %c0_i32_0 = arith.constant 0 : i32
    return %arg0, %c0_i32 : i32, i32
  }
  func.func @transform_1(%arg0: i32) -> (i32, i32) {
    %c0_i32 = arith.constant 0 : i32
    %c0_i32_0 = arith.constant 0 : i32
    %c0_i32_1 = arith.constant 0 : i32
    return %c0_i32, %c0_i32_0 : i32, i32
  }
  func.func @transform_2(%arg0: i32) -> (i32, i32) {
    %c0_i32 = arith.constant 0 : i32
    %c0_i32_0 = arith.constant 0 : i32
    %c0_i32_1 = arith.constant 0 : i32
    return %c0_i32, %c0_i32_0 : i32, i32
  }
  func.func @transform_3(%arg0: i32) -> (i32, i32) {
    %c0_i32 = arith.constant 0 : i32
    %c0_i32_0 = arith.constant 0 : i32
    %c0_i32_1 = arith.constant 0 : i32
    return %c0_i32, %c0_i32_0 : i32, i32
  }
  func.func @transform_4(%arg0: i32) -> (i32, i32) {
    %c0_i32 = arith.constant 0 : i32
    %c0_i32_0 = arith.constant 0 : i32
    %c0_i32_1 = arith.constant 0 : i32
    return %c0_i32, %c0_i32_0 : i32, i32
  }
  func.func @transform_5(%arg0: i32) -> (i32, i32) {
    %c0_i32 = arith.constant 0 : i32
    %c0_i32_0 = arith.constant 0 : i32
    return %arg0, %c0_i32 : i32, i32
  }
}

</mosaic_0001>

<bundles_post_ra>
// kernel: mlp_layers_forward.1
= control target key start
LH: loop header
LB: loop body
LE: loop exit
PB: predicated region body
PF: predicated region fallthrough
CT: control target
= control target key end

     0   :  { %s379_s1 = inlined_call_operand.vmem [shape: bf16[128,128], index: 1, kind: input, shape index: {}]   ;;  %s380_s3 = inlined_call_operand.vmem [shape: bf16[128,128], index: 3, kind: input, shape index: {}]   ;;  %s381_s2 = inlined_call_operand.vmem [shape: f32[1,128], index: 2, kind: input, shape index: {}]   ;;  %s382_s0 = inlined_call_operand.vmem [shape: bf16[16,128], index: 0, kind: input, shape index: {}]   ;;  %s383_s4 = inlined_call_operand.vmem [shape: f32[1,128], index: 4, kind: input, shape index: {}]   ;;  %s384_s5 = inlined_call_operand.vmem [shape: f32[16,128], index: 5, kind: output, shape index: {}]  }
   0x1   :  { %v275_v0 = vld [vmem:[%s379_s1 + $0x38] sm:$0xff]  ;;  %v274_v1 = vld [vmem:[%s379_s1 + $0x30] sm:$0xff]  ;;  %v273_v4 = vld [vmem:[%s379_s1 + $0x28] sm:$0xff] }
   0x2   :  { %96 = vmatpush.bf16.msra.mxu0 %v275_v0  ;;  %v283_v2 = vld [vmem:[%s380_s3 + $0x38] sm:$0xff]  ;;  %v282_v3 = vld [vmem:[%s380_s3 + $0x30] sm:$0xff]  ;;  %v281_v5 = vld [vmem:[%s380_s3 + $0x28] sm:$0xff] }
   0x3   :  { %179 = vmatpush.bf16.msra.mxu1 %v283_v2  ;;  %v272_v6 = vld [vmem:[%s379_s1 + $0x20] sm:$0xff]  ;;  %v271_v8 = vld [vmem:[%s379_s1 + $0x18] sm:$0xff]  ;;  %v270_v10 = vld [vmem:[%s379_s1 + $0x10] sm:$0xff] }
   0x4   :  { %v280_v7 = vld [vmem:[%s380_s3 + $0x20] sm:$0xff]  ;;  %v279_v9 = vld [vmem:[%s380_s3 + $0x18] sm:$0xff]  ;;  %v269_v11 = vld [vmem:[%s379_s1 + $0x8] sm:$0xff] }
   0x5   :  { %v268_v12 = vld [vmem:[%s379_s1] sm:$0xff]  ;;  %v278_v14 = vld [vmem:[%s380_s3 + $0x10] sm:$0xff]  ;;  %v277_v15 = vld [vmem:[%s380_s3 + $0x8] sm:$0xff] }
   0x6   :  { %97 = vmatpush.bf16.msra.mxu0 %v274_v1  ;;  %v267_v13 = vld [vmem:[%s382_s0] sm:$0xff] }
   0x7   :  { %180 = vmatpush.bf16.msra.mxu1 %v282_v3  ;;  %v276_v16 = vld [vmem:[%s380_s3] sm:$0xff] }
   0x8   :  { %v284_v18 = vld [vmem:[%s381_s2] ss:$0 sm:$0xff] }
   0x9   :  { %v285_v23 = vld [vmem:[%s383_s4] ss:$0 sm:$0xff] }
   0xa   :  { %98 = vmatpush.bf16.msra.mxu0 %v273_v4 }
   0xb   :  { %181 = vmatpush.bf16.msra.mxu1 %v281_v5 }
   0xe   :  { %99 = vmatpush.bf16.msra.mxu0 %v272_v6 }
   0xf   :  { %182 = vmatpush.bf16.msra.mxu1 %v280_v7 }
  0x12   :  { %100 = vmatpush.bf16.msra.mxu0 %v271_v8 }
  0x13   :  { %183 = vmatpush.bf16.msra.mxu1 %v279_v9 }
  0x16   :  { %101 = vmatpush.bf16.msra.mxu0 %v270_v10 }
  0x17   :  { %184 = vmatpush.bf16.msra.mxu1 %v278_v14 }
  0x1a   :  { %102 = vmatpush.bf16.msra.mxu0 %v269_v11 }
  0x1b   :  { %185 = vmatpush.bf16.msra.mxu1 %v277_v15 }
  0x1e   :  { %103 = vmatpush.bf16.msra.mxu0 %v268_v12 }
  0x1f   :  { %186 = vmatpush.bf16.msra.mxu1 %v276_v16 }
  0x21   :  { %104 = vmatmul.bf16.vlgmr.msra.gmra.mxu0 %v267_v13 }
  0x9e   :  { %v105_v17 = vpop.f32.mrf.mxu0 }
  0x9f   :  { %v106_v20 = vadd.f32 %v284_v18, %v105_v17 }
  0xa6   :  { %v107_v19 = vpop.f32.mrf.mxu0 }
  0xa7   :  { %v108_v21 = vadd.f32 %v284_v18, %v107_v19 }
  0xa9   :  { %v110_v22 = vpack.c.bf16 %v108_v21, %v106_v20 }
  0xab   :  { %187 = vmatmul.bf16.vlgmr.msra.gmra.mxu1 %v110_v22 }
 0x128   :  { %v188_v24 = vpop.f32.mrf.mxu1 }
 0x129   :  { %v189_v25 = vadd.f32 %v285_v23, %v188_v24 }
 0x12b   :  { %193 = vst [vmem:[%s384_s5] sm:$0xff] %v189_v25 }
 0x130   :  { %v190_v26 = vpop.f32.mrf.mxu1 }
 0x131   :  { %v191_v27 = vadd.f32 %v285_v23, %v190_v26 }
 0x133   :  { %194 = vst [vmem:[%s384_s5 + $0x8] sm:$0xff] %v191_v27 }

</bundles_post_ra>
